<compile_context>
chip_gen: v6e
topology: v6e:2x2x1
jax: 0.10.0
libtpu: 0.0.40
codegen_flags: <defaults>
</compile_context>

<pallas_src>
import numpy as np
import jax
import jax.numpy as jnp
from jax import lax
from jax.experimental import pallas as pl
from jax.experimental.pallas import tpu as pltpu

_UNION_EPS = 1e-6        # hard-coded in IoULoss.forward (constructor eps unused)
_LANE = 128


def _round_up(a, b):
    return (a + b - 1) // b * b


def _round_down(a, b):
    return a // b * b


# ---------------- Pallas kernel ----------------------------------------------

def _make_iou_kernel(tb, tl, L, unroll):
    """Kernel for blocks of (tb batch rows) x (tl flattened-pixel columns)."""
    n_chunks = tl // _LANE               # tl is always a multiple of 128
    need_mask = (L % tl) != 0            # only then can a block read past col L

    def kernel(x_ref, y_ref, out_ref, inter_acc, sum_acc):
        li = pl.program_id(1)            # reduction axis over flattened H*W

        @pl.when(li == 0)
        def _init():
            inter_acc[...] = jnp.zeros_like(inter_acc)
            sum_acc[...] = jnp.zeros_like(sum_acc)

        if need_mask:
            lane = lax.broadcasted_iota(jnp.int32, (tb, _LANE), 1)

        def chunk(c, carry):
            inter, ssum = carry
            off = pl.multiple_of(c * _LANE, _LANE)
            # native-dtype loads; accumulate in f32 (matches PyTorch f32 sums)
            xc = x_ref[:, pl.ds(off, _LANE)].astype(jnp.float32)
            yc = y_ref[:, pl.ds(off, _LANE)].astype(jnp.float32)
            if need_mask:
                valid = (lane + (li * tl + off)) < L
                xc = jnp.where(valid, xc, 0.0)
                yc = jnp.where(valid, yc, 0.0)
            return inter + xc * yc, ssum + (xc + yc)

        zeros = jnp.zeros((tb, _LANE), jnp.float32)
        inter_p, sum_p = lax.fori_loop(0, n_chunks, chunk, (zeros, zeros),
                                       unroll=unroll)
        inter_acc[...] += inter_p
        sum_acc[...] += sum_p

        @pl.when(li == pl.num_programs(1) - 1)
        def _finalize():
            # single cross-lane reduction per accumulator, once per batch block
            inter = jnp.sum(inter_acc[...], axis=1, keepdims=True)        # (tb, 1)
            union = jnp.sum(sum_acc[...], axis=1, keepdims=True) - inter
            loss = 1.0 - inter / (union + _UNION_EPS)
            out_ref[...] = jnp.broadcast_to(loss, out_ref.shape)          # lane-dense

    return kernel


# ---------------- wrapper ------------------------------------------------------

def iou_loss(x, y, *, max_block_bytes=4 << 20):
    """IoULoss.forward.  x, y: (B, H, W) masks.  Returns the per-image loss (B,)."""
    assert x.shape == y.shape, "x and y must have matching shapes"
    B = x.shape[0]
    L = int(np.prod(x.shape[1:]))

    # Stream in native dtype (f32 / bf16): no padded / casted copies in HBM.
    native = (x.dtype == y.dtype) and (
        x.dtype in (np.dtype(jnp.float32), np.dtype(jnp.bfloat16)))
    dt = x.dtype if native else jnp.float32
    xf = x.reshape(B, L) if native else x.reshape(B, L).astype(dt)
    yf = y.reshape(B, L) if native else y.reshape(B, L).astype(dt)

    # Tiny-image fallback only: we need at least one full 128-lane tile per row.
    if L < _LANE:
        pad = _LANE - L
        xf = jnp.pad(xf, ((0, 0), (0, pad)))
        yf = jnp.pad(yf, ((0, 0), (0, pad)))
        L_eff = _LANE
    else:
        L_eff = L

    itemsize = np.dtype(dt).itemsize
    sub = {4: 8, 2: 16, 1: 32}[itemsize]            # sublane multiple for dtype

    # ---- tiling: lane dim tl is a multiple of 128 and never exceeds the row --
    tb = B if B <= sub else sub
    cap_cols = max(_LANE,
                   _round_down(max_block_bytes // (tb * itemsize), _LANE))
    tl = min(cap_cols, _round_down(L_eff, _LANE))
    grid_l = pl.cdiv(L_eff, tl)

    # One L-block per row and many rows: pack more rows per step, but keep at
    # least 2 batch blocks when possible (v7x shards the parallel axis on 2 TCs).
    if grid_l == 1 and B > sub:
        max_tb = max(sub, _round_down(max_block_bytes // (tl * itemsize), sub))
        if B >= 2 * sub:
            max_tb = min(max_tb,
                         max(sub, _round_down(_round_up(B, sub) // 2, sub)))
        tb = max(sub, min(max_tb, _round_down(B, sub)))
    grid_b = pl.cdiv(B, tb)
    grid = (grid_b, grid_l)

    in_block_bytes = tb * tl * itemsize
    n_chunks = tl // _LANE
    if n_chunks <= 8:
        unroll = True
    elif n_chunks % 8 == 0:
        unroll = 8
    elif n_chunks % 4 == 0:
        unroll = 4
    elif n_chunks % 2 == 0:
        unroll = 2
    else:
        unroll = 1

    # 3-deep input buffering only pays off for small blocks with several L steps.
    use_buf3 = in_block_bytes <= (3 << 19) and grid_l >= 3
    buf_kwargs = {"pipeline_mode": pl.Buffered(3)} if use_buf3 else {}
    in_spec = pl.BlockSpec((tb, tl), lambda b, l: (b, l), **buf_kwargs)

    n_bufs = 3 if use_buf3 else 2
    vmem_needed = 2 * n_bufs * in_block_bytes + 4 * tb * _LANE * 4 + (4 << 20)
    vmem_limit = int(min(max(vmem_needed, 32 << 20), 40 << 20))

    cost = pl.CostEstimate(
        flops=5 * B * L_eff,
        transcendentals=0,
        bytes_accessed=2 * B * L_eff * itemsize + B * _LANE * 4,
    )

    out = pl.pallas_call(
        _make_iou_kernel(tb, tl, L_eff, unroll),
        out_shape=jax.ShapeDtypeStruct((B, _LANE), jnp.float32),
        grid_spec=pltpu.PrefetchScalarGridSpec(
            num_scalar_prefetch=0,
            grid=grid,
            in_specs=[in_spec, in_spec],
            out_specs=pl.BlockSpec((tb, _LANE), lambda b, l: (b, 0)),
            scratch_shapes=[
                pltpu.VMEM((tb, _LANE), jnp.float32),   # per-lane intersection
                pltpu.VMEM((tb, _LANE), jnp.float32),   # per-lane sum(x)+sum(y)
            ],
        ),
        compiler_params=pltpu.CompilerParams(
            dimension_semantics=("parallel", "arbitrary"),
            vmem_limit_bytes=vmem_limit,
        ),
        cost_estimate=cost,
    )(xf, yf)

    return out[:, 0]


# ---------------- pure-JAX reference (sanity check only) ----------------------

def _ref_iou_loss(x, y):
    B = x.shape[0]
    xf = x.reshape(B, -1).astype(jnp.float32)
    yf = y.reshape(B, -1).astype(jnp.float32)
    inter = jnp.sum(xf * yf, axis=1)
    union = jnp.sum(xf, axis=1) + jnp.sum(yf, axis=1) - inter
    return 1.0 - inter / (union + _UNION_EPS)


# ---------------- main ---------------------------------------------------------

if __name__ == "__main__":
    key = jax.random.PRNGKey(0)
    kx, ky = jax.random.split(key)
    B, H, W = 2, 16, 16
    x = jax.random.uniform(kx, (B, H, W), dtype=jnp.float32)   # mask-like in [0, 1)
    y = jax.random.uniform(ky, (B, H, W), dtype=jnp.float32)

    loss = jax.block_until_ready(iou_loss(x, y))
    assert loss.shape == (B,)
    np.testing.assert_allclose(np.asarray(loss), np.asarray(_ref_iou_loss(x, y)),
                               rtol=1e-5, atol=1e-6)

    # ragged / multi-L-block path: L = 9*15 = 135 (not a multiple of 128)
    # exercises the in-kernel lane mask that replaced the wrapper-side padding.
    kx2, ky2 = jax.random.split(ky)
    x2 = jax.random.uniform(kx2, (5, 9, 15), dtype=jnp.float32)
    y2 = jax.random.uniform(ky2, (5, 9, 15), dtype=jnp.float32)
    loss2 = jax.block_until_ready(iou_loss(x2, y2))
    np.testing.assert_allclose(np.asarray(loss2), np.asarray(_ref_iou_loss(x2, y2)),
                               rtol=1e-5, atol=1e-6)

    # TODO(synk): the PyTorch forward also prints the tensors' device — a
    # host-side side effect with no Pallas equivalent; intentionally omitted.
    print("KERNEL_OK")
</pallas_src>

<mosaic_0001>
module attributes {stable_mosaic.version = 11 : i64} {
  func.func @kernel(%arg0: i32, %arg1: i32, %arg2: memref<2x256xf32, #tpu.memory_space<vmem>>, %arg3: memref<2x256xf32, #tpu.memory_space<vmem>>, %arg4: memref<2x128xf32, #tpu.memory_space<vmem>>, %arg5: memref<2x128xf32, #tpu.memory_space<vmem>>, %arg6: memref<2x128xf32, #tpu.memory_space<vmem>>) attributes {dimension_semantics = [#tpu.dimension_semantics<parallel>, #tpu.dimension_semantics<arbitrary>], iteration_bounds = array<i64: 1, 1>, scalar_prefetch = 0 : i64, scratch_operands = 2 : i64, tpu.core_type = #tpu.core_type<tc>, window_params = [{transform_indices = @transform_0, window_bounds = array<i64: 2, 256>}, {transform_indices = @transform_1, window_bounds = array<i64: 2, 256>}, {transform_indices = @transform_2, window_bounds = array<i64: 2, 128>}]} {
    %c0_i32 = arith.constant 0 : i32
    %0 = arith.cmpi eq, %arg1, %c0_i32 : i32
    %1 = arith.extui %0 : i1 to i32
    %c0_i32_0 = arith.constant 0 : i32
    %2 = arith.cmpi ne, %1, %c0_i32_0 : i32
    scf.if %2 {
      %cst_16 = arith.constant 0.000000e+00 : f32
      %33 = vector.broadcast %cst_16 : f32 to vector<2x128xf32>
      %c0_17 = arith.constant 0 : index
      %c0_18 = arith.constant 0 : index
      %34 = vector.load %arg5[%c0_17, %c0_18] : memref<2x128xf32, #tpu.memory_space<vmem>>, vector<2x128xf32>
      tpu.vector_store %arg5[%c0_17, %c0_18], %33 {strides = array<i32>} : memref<2x128xf32, #tpu.memory_space<vmem>>, vector<2x128xf32>,
      %cst_19 = arith.constant 0.000000e+00 : f32
      %35 = vector.broadcast %cst_19 : f32 to vector<2x128xf32>
      %c0_20 = arith.constant 0 : index
      %c0_21 = arith.constant 0 : index
      %36 = vector.load %arg6[%c0_20, %c0_21] : memref<2x128xf32, #tpu.memory_space<vmem>>, vector<2x128xf32>
      tpu.vector_store %arg6[%c0_20, %c0_21], %35 {strides = array<i32>} : memref<2x128xf32, #tpu.memory_space<vmem>>, vector<2x128xf32>,
    } else {
    }
    %cst = arith.constant 0.000000e+00 : f32
    %3 = vector.broadcast %cst : f32 to vector<2x128xf32>
    %c0_i32_1 = arith.constant 0 : i32
    %c128_i32 = arith.constant 128 : i32
    %4 = arith.muli %c0_i32_1, %c128_i32 : i32
    %5 = tpu.assume_multiple %4, 128 : i32
    %c0 = arith.constant 0 : index
    %6 = arith.index_cast %5 : i32 to index
    %7 = vector.load %arg2[%c0, %6] : memref<2x256xf32, #tpu.memory_space<vmem>>, vector<2x128xf32>
    %c0_2 = arith.constant 0 : index
    %8 = arith.index_cast %5 : i32 to index
    %9 = vector.load %arg3[%c0_2, %8] : memref<2x256xf32, #tpu.memory_space<vmem>>, vector<2x128xf32>
    %10 = arith.mulf %7, %9 : vector<2x128xf32>
    %11 = arith.addf %3, %10 : vector<2x128xf32>
    %12 = arith.addf %7, %9 : vector<2x128xf32>
    %13 = arith.addf %3, %12 : vector<2x128xf32>
    %c1_i32 = arith.constant 1 : i32
    %c128_i32_3 = arith.constant 128 : i32
    %14 = arith.muli %c1_i32, %c128_i32_3 : i32
    %15 = tpu.assume_multiple %14, 128 : i32
    %c0_4 = arith.constant 0 : index
    %16 = arith.index_cast %15 : i32 to index
    %17 = vector.load %arg2[%c0_4, %16] : memref<2x256xf32, #tpu.memory_space<vmem>>, vector<2x128xf32>
    %c0_5 = arith.constant 0 : index
    %18 = arith.index_cast %15 : i32 to index
    %19 = vector.load %arg3[%c0_5, %18] : memref<2x256xf32, #tpu.memory_space<vmem>>, vector<2x128xf32>
    %20 = arith.mulf %17, %19 : vector<2x128xf32>
    %21 = arith.addf %11, %20 : vector<2x128xf32>
    %22 = arith.addf %17, %19 : vector<2x128xf32>
    %23 = arith.addf %13, %22 : vector<2x128xf32>
    %c2_i32 = arith.constant 2 : i32
    %c0_6 = arith.constant 0 : index
    %c0_7 = arith.constant 0 : index
    %24 = vector.load %arg5[%c0_6, %c0_7] : memref<2x128xf32, #tpu.memory_space<vmem>>, vector<2x128xf32>
    %25 = arith.addf %24, %21 : vector<2x128xf32>
    %c0_8 = arith.constant 0 : index
    %c0_9 = arith.constant 0 : index
    %26 = vector.load %arg5[%c0_8, %c0_9] : memref<2x128xf32, #tpu.memory_space<vmem>>, vector<2x128xf32>
    tpu.vector_store %arg5[%c0_8, %c0_9], %25 {strides = array<i32>} : memref<2x128xf32, #tpu.memory_space<vmem>>, vector<2x128xf32>,
    %c0_10 = arith.constant 0 : index
    %c0_11 = arith.constant 0 : index
    %27 = vector.load %arg6[%c0_10, %c0_11] : memref<2x128xf32, #tpu.memory_space<vmem>>, vector<2x128xf32>
    %28 = arith.addf %27, %23 : vector<2x128xf32>
    %c0_12 = arith.constant 0 : index
    %c0_13 = arith.constant 0 : index
    %29 = vector.load %arg6[%c0_12, %c0_13] : memref<2x128xf32, #tpu.memory_space<vmem>>, vector<2x128xf32>
    tpu.vector_store %arg6[%c0_12, %c0_13], %28 {strides = array<i32>} : memref<2x128xf32, #tpu.memory_space<vmem>>, vector<2x128xf32>,
    %c0_i32_14 = arith.constant 0 : i32
    %30 = arith.cmpi eq, %arg1, %c0_i32_14 : i32
    %31 = arith.extui %30 : i1 to i32
    %c0_i32_15 = arith.constant 0 : i32
    %32 = arith.cmpi ne, %31, %c0_i32_15 : i32
    scf.if %32 {
      %c0_16 = arith.constant 0 : index
      %c0_17 = arith.constant 0 : index
      %33 = vector.load %arg5[%c0_16, %c0_17] : memref<2x128xf32, #tpu.memory_space<vmem>>, vector<2x128xf32>
      %cst_18 = arith.constant dense<0.000000e+00> : vector<2xf32>
      %34 = vector.multi_reduction <add>, %33, %cst_18 [1] : vector<2x128xf32> to vector<2xf32>
      %35 = vector.shape_cast %34 : vector<2xf32> to vector<2x1xf32>
      %c0_19 = arith.constant 0 : index
      %c0_20 = arith.constant 0 : index
      %36 = vector.load %arg6[%c0_19, %c0_20] : memref<2x128xf32, #tpu.memory_space<vmem>>, vector<2x128xf32>
      %cst_21 = arith.constant dense<0.000000e+00> : vector<2xf32>
      %37 = vector.multi_reduction <add>, %36, %cst_21 [1] : vector<2x128xf32> to vector<2xf32>
      %38 = vector.shape_cast %37 : vector<2xf32> to vector<2x1xf32>
      %39 = arith.subf %38, %35 : vector<2x1xf32>
      %cst_22 = arith.constant 9.99999997E-7 : f32
      %40 = vector.broadcast %cst_22 : f32 to vector<2x1xf32>
      %41 = arith.addf %39, %40 : vector<2x1xf32>
      %42 = arith.divf %35, %41 : vector<2x1xf32>
      %cst_23 = arith.constant 1.000000e+00 : f32
      %43 = vector.broadcast %cst_23 : f32 to vector<2x1xf32>
      %44 = arith.subf %43, %42 : vector<2x1xf32>
      %45 = vector.shape_cast %44 : vector<2x1xf32> to vector<2x1xf32>
      %46 = vector.broadcast %45 : vector<2x1xf32> to vector<2x128xf32>
      %c0_24 = arith.constant 0 : index
      %c0_25 = arith.constant 0 : index
      %47 = vector.load %arg4[%c0_24, %c0_25] : memref<2x128xf32, #tpu.memory_space<vmem>>, vector<2x128xf32>
      tpu.vector_store %arg4[%c0_24, %c0_25], %46 {strides = array<i32>} : memref<2x128xf32, #tpu.memory_space<vmem>>, vector<2x128xf32>,
    } else {
    }
    return
  }
  func.func @transform_0(%arg0: i32, %arg1: i32) -> (i32, i32) {
    %c0_i32 = arith.constant 0 : i32
    return %arg0, %arg1 : i32, i32
  }
  func.func @transform_1(%arg0: i32, %arg1: i32) -> (i32, i32) {
    %c0_i32 = arith.constant 0 : i32
    return %arg0, %arg1 : i32, i32
  }
  func.func @transform_2(%arg0: i32, %arg1: i32) -> (i32, i32) {
    %c0_i32 = arith.constant 0 : i32
    %c0_i32_0 = arith.constant 0 : i32
    return %arg0, %c0_i32 : i32, i32
  }
}

</mosaic_0001>

<bundles_post_ra>
// kernel: tpu_custom_call.1
= control target key start
LH: loop header
LB: loop body
LE: loop exit
PB: predicated region body
PF: predicated region fallthrough
CT: control target
= control target key end

     0   :  { %7 = vsyncpa [#allocation5], 0  ;;  %s196_s0 = inlined_call_operand.hbm [shape: f32[2,256], index: 0, kind: input, shape index: {}]   ;;  %s197_s1 = inlined_call_operand.hbm [shape: f32[2,256], index: 1, kind: input, shape index: {}]   ;;  %s198_s2 = inlined_call_operand.hbm [shape: f32[2,128], index: 2, kind: output, shape index: {}]  }
   0x1   :  { %8 = vsyncpa [#allocation8], 0 }
   0x2   :  { %9 = vsyncpa [#allocation6], 0  ;;  %s168_s9 = smov [#allocation4]   ;;  %s169_s11 = smov [#allocation7]  }
   0x3   :  { %s16_s10 = sshll.u32 %s168_s9, 4  ;;  %s26_s12 = sshll.u32 %s169_s11, 4  ;;  %s17_s10 = int_to_ptr.vmem [resolvable:$true] %s16_s10  ;;  %s27_s12 = int_to_ptr.vmem [resolvable:$true] %s26_s12 }
   0x4   :  { %s110_s13 = scalar_lea.vmem %s17_s10, 64  ;;  %p115_p1 = scmp.lt.s32.totalorder %s17_s10, %s17_s10 }
   0x5   :  { %p111_p0 = scmp.ne.s32.totalorder %s17_s10, %s110_s13  ;;  %p116_p2 = scmp.lt.s32.totalorder %s110_s13, %s110_s13 }
   0x7   :  { %p117_p3 = por %p116_p2, %p115_p1 }
   0x9   :  { %p118_p4 = pnand %p117_p3, %p111_p0 }
   0xb   :  { %121 = shalt.err (!%p118_p4)
}
   0xc   :  { %19 = dma.hbm_to_vmem [thread:$0]  %s196_s0, 64, %s17_s10, [#allocation5]  }
   0xd   :  { %s130_s16 = scalar_lea.vmem %s27_s12, 64  ;;  %p135_p6 = scmp.lt.s32.totalorder %s27_s12, %s27_s12 }
   0xe   :  { %p131_p5 = scmp.ne.s32.totalorder %s27_s12, %s130_s16  ;;  %p136_p7 = scmp.lt.s32.totalorder %s130_s16, %s130_s16 }
  0x10   :  { %p137_p8 = por %p136_p7, %p135_p6 }
  0x12   :  { %p138_p9 = pnand %p137_p8, %p131_p5 }
  0x14   :  { %141 = shalt.err (!%p138_p9)
}
  0x15   :  { %29 = dma.hbm_to_vmem [thread:$0]  %s197_s1, 64, %s27_s12, [#allocation8]  }
  0x16   :  { %162 = dma.done.wait [#allocation5], 64  }
  0x17   :  { %163 = vsyncadd [#allocation5], 4294967232 }
  0x18   :  { %164 = dma.done.wait [#allocation8], 64  }
  0x19   :  { %165 = vsyncadd [#allocation8], 4294967232  ;;  %v170_v0 = vmov 0.0   ;;  %v42_v1 = vld [vmem:[#allocation4] sm:$0x3]  ;;  %vm66_vm0 = vcmask 1041408  }
  0x1a   :  { %40 = vst [vmem:[#allocation2] sm:$0x3] %v170_v0  ;;  %41 = vst [vmem:[#allocation3] sm:$0x3] %v170_v0  ;;  %v43_v2 = vld [vmem:[#allocation7] sm:$0x3] }
  0x1b   :  { %v49_v3 = vld [vmem:[#allocation4 + $0x2] sm:$0x3]  ;;  %v44_v4 = vmul.f32 %v43_v2, %v42_v1  ;;  %v51_v5 = vld [vmem:[#allocation7 + $0x2] sm:$0x3]  ;;  %v46_v6 = vadd.f32 %v43_v2, %v42_v1  ;;  %s171_s0 = smov [#allocation9]  }
  0x1c   :  { %v52_v7 = vmul.f32 %v51_v5, %v49_v3  ;;  %v54_v8 = vadd.f32 %v51_v5, %v49_v3  ;;  %s86_s1 = sshll.u32 %s171_s0, 4  ;;  %s87_s1 = int_to_ptr.vmem [resolvable:$true] %s86_s1 }
  0x1d   :  { %s142_s19 = scalar_lea.vmem %s87_s1, 32  ;;  %p147_p11 = scmp.lt.s32.totalorder %s87_s1, %s87_s1 }
  0x1e   :  { %v53_v11 = vadd.f32 %v52_v7, %v44_v4  ;;  %v55_v12 = vadd.f32 %v54_v8, %v46_v6  ;;  %p143_p10 = scmp.ne.s32.totalorder %s87_s1, %s142_s19  ;;  %p148_p12 = scmp.lt.s32.totalorder %s142_s19, %s142_s19 }
  0x20   :  { %p149_p13 = por %p148_p12, %p147_p11 }
  0x21   :  { %v56_v9 = vld [vmem:[#allocation2] sm:$0x3]  ;;  %v59_v10 = vld [vmem:[#allocation3] sm:$0x3] }
  0x22   :  { %v57_v13 = vadd.f32 %v56_v9, %v53_v11  ;;  %v60_v14 = vadd.f32 %v59_v10, %v55_v12  ;;  %p150_p0 = pnand %p149_p13, %p143_p10 }
  0x24   :  { %58 = vst [vmem:[#allocation2] sm:$0x3] %v57_v13  ;;  %61 = vst [vmem:[#allocation3] sm:$0x3] %v60_v14 }
  0x2b   :  { %v65_v15 = vld [vmem:[#allocation2] sm:$0x3]  ;;  %v70_v16 = vld [vmem:[#allocation3] sm:$0x3] }
  0x2c   :  { %v67_v17 = vsel %vm66_vm0, %v65_v15, 0.0  ;;  %v71_v18 = vsel %vm66_vm0, %v70_v16, 0.0 }
  0x2d   :  { %68 = vadd.xlane.f32.xlu0 %v67_v17 }
  0x31   :  { %72 = vadd.xlane.f32.xlu0 %v71_v18 }
  0xb6   :  { %v69_v19 = vpop.xlane.xlu0 %68 }
  0xba   :  { %v73_v20 = vpop.xlane.xlu0 %72 }
  0xbb   :  { %v74_v21 = vsub.f32 %v73_v20, %v69_v19 }
  0xbd   :  { %v75_v22 = vadd.f32 1e-06, %v74_v21 }
  0xbf   :  { %100 = vrcp.f32 %v75_v22 }
  0xcc   :  { %v101_v23 = vpop.eup %100 }
  0xcd   :  { %v77_v24 = vmul.f32 %v101_v23, %v69_v19 }
  0xcf   :  { %v78_v25 = vsub.f32 1.0, %v77_v24 }
  0xd1   :  { %79 = vst [vmem:[#allocation9] sm:$0x3] %v78_v25 }
  0xd2   :  { %153 = shalt.err (!%p150_p0)
}
  0xd3   :  { %89 = dma.vmem_to_hbm [thread:$0]  %s87_s1, 32, %s198_s2, [#allocation6]  }
  0xd4   :  { %166 = dma.done.wait [#allocation6], 32  }
  0xd5   :  { %167 = vsyncadd [#allocation6], 4294967264 }
  0xd6   :  { %93 = vsyncpa [#allocation5], 1 }
  0xd7   :  { %94 = vsyncpa [#allocation8], 1 }
  0xd8   :  { %95 = vsyncpa [#allocation6], 1 }

</bundles_post_ra>
